<compile_context>
chip_gen: v7x
topology: tpu7x:2x2x1
jax: 0.10.0
libtpu: 0.0.40
codegen_flags: <defaults>
</compile_context>

<pallas_src>
import jax
import jax.numpy as jnp
from jax import lax
from jax.experimental import pallas as pl
from jax.experimental.pallas import tpu as pltpu

NEG_MASK = -1.0e9    # matches masked_fill(~context_mask, -1e9)


def qa_head_kernel(h_ref, w_ref, b_ref, cmask_ref, starts_ref, ends_ref,
                   logp_ref, pans_ref):
    """QA head for one fused batch block: linear -> mask -> log_softmax -> gather."""
    bblk, S, _ = h_ref.shape
    K = starts_ref.shape[-1]

    w = w_ref[...]          # (2, H) bf16  (nn.Linear weight, PyTorch layout)
    bias = b_ref[...]       # (2, 1) f32
    # Position ids along sublanes, reused for the one-hot gathers.
    pos = lax.broadcasted_iota(jnp.int32, (S, K), 0)

    # Static unroll over the fused batch block (bblk is small).
    for i in range(bblk):
        h = h_ref[i]        # (S, H) bf16, natural layout

        # logits in lane-dense (2, S): W @ h^T with the transpose folded into the
        # dot_general dimension numbers (MXU NT matmul, f32 accumulation).
        logits = lax.dot_general(
            w, h, (((1,), (1,)), ((), ())),
            preferred_element_type=jnp.float32) + bias          # (2, S)

        # masked_fill(~context_mask, -1e9)
        cmask = cmask_ref[i] > 0                                # (1, S) bool
        masked = jnp.where(cmask, logits, NEG_MASK)             # (2, S)

        # log_softmax over the sequence dim (lanes).
        m = jnp.max(masked, axis=-1, keepdims=True)             # (2, 1)
        z = masked - m
        lse = jnp.log(jnp.sum(jnp.exp(z), axis=-1, keepdims=True))
        logp = z - lse                                          # (2, S)
        logp_ref[i] = logp                                      # lane-dense slab store

        # torch.gather(log_probs, 1, starts/ends) via one-hot (S, K) + tiny matmul.
        # NOTE: indices outside [0, S) gather 0.0 instead of erroring like
        # torch.gather; such candidates must be masked out by start_mask.
        oh_s = (pos == starts_ref[i]).astype(jnp.float32)       # (S, K)
        oh_e = (pos == ends_ref[i]).astype(jnp.float32)         # (S, K)
        p_st = jnp.dot(logp[0:1, :], oh_s,
                       preferred_element_type=jnp.float32)      # (1, K)
        p_en = jnp.dot(logp[1:2, :], oh_e,
                       preferred_element_type=jnp.float32)      # (1, K)
        pans_ref[i] = p_st + p_en                               # p_answers, lane-dense


def _choose_block_b(B, max_block=8):
    """Fuse several examples per grid step, but keep >= 2 steps for v7x megacore."""
    target = max(1, min(max_block, B // 2)) if B >= 2 else 1
    for bb in range(target, 0, -1):
        if B % bb == 0:
            return bb
    return 1


def qa_forward(last_hidden_state, head_w, head_b, context_mask,
               starts, ends, start_mask, *, block_b=None):
    """QA head forward.

    last_hidden_state: [B, S, H]   (stand-in for RobertaModel output; bf16 preferred)
    head_w: [2, H], head_b: [2]    (nn.Linear(hidden, 2))
    context_mask: [B, S] bool
    starts/ends: [B, K] int32, start_mask: [B, K] bool
    returns (start_log_probs [B,S], end_log_probs [B,S], loss scalar)
    """
    B, S, H = last_hidden_state.shape
    K = starts.shape[1]
    bblk = block_b if block_b is not None else _choose_block_b(B)
    assert B % bblk == 0

    # Keep the dominant operand in bf16 and in its natural [B, S, H] layout.
    h = last_hidden_state.astype(jnp.bfloat16)
    w = head_w.astype(jnp.bfloat16)                         # (2, H)
    bias = head_b.reshape(2, 1).astype(jnp.float32)         # (2, 1)
    cmask3 = context_mask.astype(jnp.int32).reshape(B, 1, S)    # lane-dense
    starts3 = starts.astype(jnp.int32).reshape(B, 1, K)         # lane-dense
    ends3 = ends.astype(jnp.int32).reshape(B, 1, K)

    # NOTE: at real encoder sizes (H=768-1024, S up to 4096) re-derive the
    # (bblk, S_tile) block against v7x's 64 MiB VMEM / 32 MiB scoped default
    # and set vmem_limit_bytes; at these toy sizes the defaults are ample.
    logp, pans = pl.pallas_call(
        qa_head_kernel,
        out_shape=(
            jax.ShapeDtypeStruct((B, 2, S), jnp.float32),   # [start; end] log-probs
            jax.ShapeDtypeStruct((B, 1, K), jnp.float32),   # gathered p_answers
        ),
        grid_spec=pltpu.PrefetchScalarGridSpec(
            num_scalar_prefetch=0,
            grid=(B // bblk,),
            in_specs=[
                pl.BlockSpec((bblk, S, H), lambda b: (b, 0, 0)),   # hidden (natural)
                pl.BlockSpec((2, H), lambda b: (0, 0)),            # head weight
                pl.BlockSpec((2, 1), lambda b: (0, 0)),            # head bias
                pl.BlockSpec((bblk, 1, S), lambda b: (b, 0, 0)),   # context mask
                pl.BlockSpec((bblk, 1, K), lambda b: (b, 0, 0)),   # starts
                pl.BlockSpec((bblk, 1, K), lambda b: (b, 0, 0)),   # ends
            ],
            out_specs=[
                pl.BlockSpec((bblk, 2, S), lambda b: (b, 0, 0)),
                pl.BlockSpec((bblk, 1, K), lambda b: (b, 0, 0)),
            ],
        ),
        compiler_params=pltpu.CompilerParams(
            dimension_semantics=("parallel",)),
    )(h, w, bias, cmask3, starts3, ends3)

    start_log_probs = logp[:, 0, :]                 # (B, S)
    end_log_probs = logp[:, 1, :]                   # (B, S)
    p_answers = pans.reshape(B, K)

    # marginal_ll(p_answers, start_mask): masked logsumexp over candidates.
    # Done in plain JAX on the tiny [B, K] array; -inf masking matches
    # torch masked_fill(-inf) + logsumexp (all-false mask -> -inf -> inf loss).
    masked_pa = jnp.where(start_mask, p_answers, -jnp.inf)
    ll = jax.nn.logsumexp(masked_pa, axis=-1)       # (B,)
    # TODO(synk): model_utils.marginal_ll's batch-reduction convention is not
    # shown; per-example NLLs are averaged here to produce a scalar loss.
    loss = -jnp.mean(ll)
    return start_log_probs, end_log_probs, loss


if __name__ == "__main__":
    B, S, H, K, VOCAB = 4, 128, 256, 8, 100

    key = jax.random.PRNGKey(0)
    k_emb, k_w, k_b, k_ids, k_st, k_en = jax.random.split(key, 6)

    # Deterministic stand-in "encoder": bf16 embedding lookup (plain-JAX glue).
    emb_table = (0.02 * jax.random.normal(k_emb, (VOCAB, H),
                                          dtype=jnp.float32)).astype(jnp.bfloat16)
    input_ids = jax.random.randint(k_ids, (B, S), 0, VOCAB, dtype=jnp.int32)
    attention_mask = jnp.ones((B, S), dtype=jnp.int32)   # unused by the stand-in encoder
    last_hidden_state = emb_table[input_ids]             # [B, S, H] bf16

    # nn.Linear(hidden_size, 2) parameters, PyTorch-style uniform init.
    bound = 1.0 / (H ** 0.5)
    head_w = jax.random.uniform(k_w, (2, H), minval=-bound, maxval=bound,
                                dtype=jnp.float32)
    head_b = jax.random.uniform(k_b, (2,), minval=-bound, maxval=bound,
                                dtype=jnp.float32)

    # context mask: first 100 tokens are context.
    context_mask = jnp.broadcast_to(jnp.arange(S)[None, :] < 100, (B, S))

    # labels: K answer-span candidates per example, with a validity mask.
    starts = jax.random.randint(k_st, (B, K), 0, 100, dtype=jnp.int32)
    ends = jax.random.randint(k_en, (B, K), 0, 100, dtype=jnp.int32)
    start_mask = jnp.broadcast_to(jnp.arange(K)[None, :] < 3, (B, K))

    slp, elp, loss = qa_forward(last_hidden_state, head_w, head_b,
                                context_mask, starts, ends, start_mask)
    jax.block_until_ready((slp, elp, loss))
    assert slp.shape == (B, S) and elp.shape == (B, S) and loss.shape == ()
    print("KERNEL_OK")
</pallas_src>

<mosaic_0001>
module attributes {stable_mosaic.version = 11 : i64} {
  func.func @qa_head_kernel(%arg0: i32, %arg1: memref<2x128x256xbf16, #tpu.memory_space<vmem>>, %arg2: memref<2x256xbf16, #tpu.memory_space<vmem>>, %arg3: memref<2x1xf32, #tpu.memory_space<vmem>>, %arg4: memref<2x1x128xi32, #tpu.memory_space<vmem>>, %arg5: memref<2x1x8xi32, #tpu.memory_space<vmem>>, %arg6: memref<2x1x8xi32, #tpu.memory_space<vmem>>, %arg7: memref<2x2x128xf32, #tpu.memory_space<vmem>>, %arg8: memref<2x1x8xf32, #tpu.memory_space<vmem>>) attributes {dimension_semantics = [#tpu.dimension_semantics<parallel>], iteration_bounds = array<i64: 2>, scalar_prefetch = 0 : i64, scratch_operands = 0 : i64, tpu.core_type = #tpu.core_type<tc>, window_params = [{transform_indices = @transform_0, window_bounds = array<i64: 2, 128, 256>}, {pipeline_mode = #tpu.pipeline_mode<synchronous>, transform_indices = @transform_1, window_bounds = array<i64: 2, 256>}, {pipeline_mode = #tpu.pipeline_mode<synchronous>, transform_indices = @transform_2, window_bounds = array<i64: 2, 1>}, {transform_indices = @transform_3, window_bounds = array<i64: 2, 1, 128>}, {transform_indices = @transform_4, window_bounds = array<i64: 2, 1, 8>}, {transform_indices = @transform_5, window_bounds = array<i64: 2, 1, 8>}, {transform_indices = @transform_6, window_bounds = array<i64: 2, 2, 128>}, {transform_indices = @transform_7, window_bounds = array<i64: 2, 1, 8>}]} {
    %c0 = arith.constant 0 : index
    %c0_0 = arith.constant 0 : index
    %0 = vector.load %arg2[%c0, %c0_0] : memref<2x256xbf16, #tpu.memory_space<vmem>>, vector<2x256xbf16>
    %c0_1 = arith.constant 0 : index
    %c0_2 = arith.constant 0 : index
    %1 = vector.load %arg3[%c0_1, %c0_2] : memref<2x1xf32, #tpu.memory_space<vmem>>, vector<2x1xf32>
    %2 = tpu.iota {dimensions = array<i32: 0>} : vector<128x8xi32>
    %c0_3 = arith.constant 0 : index
    %c0_4 = arith.constant 0 : index
    %c0_5 = arith.constant 0 : index
    %3 = vector.load %arg1[%c0_3, %c0_4, %c0_5] : memref<2x128x256xbf16, #tpu.memory_space<vmem>>, vector<1x128x256xbf16>
    %4 = vector.shape_cast %3 : vector<1x128x256xbf16> to vector<128x256xbf16>
    %cst = arith.constant dense<0.000000e+00> : vector<2x128xf32>
    %5 = tpu.matmul %0, %4, %cst {dimension_numbers = #tpu.dot_dimension_numbers<[1], [1], [0], [0], [0, 0, 1, 0], [], []>} : vector<2x256xbf16>, vector<128x256xbf16>, vector<2x128xf32> -> vector<2x128xf32>
    %6 = vector.broadcast %1 : vector<2x1xf32> to vector<2x128xf32>
    %7 = arith.addf %5, %6 : vector<2x128xf32>
    %c0_6 = arith.constant 0 : index
    %c0_7 = arith.constant 0 : index
    %c0_8 = arith.constant 0 : index
    %8 = vector.load %arg4[%c0_6, %c0_7, %c0_8] : memref<2x1x128xi32, #tpu.memory_space<vmem>>, vector<1x1x128xi32>
    %9 = vector.shape_cast %8 : vector<1x1x128xi32> to vector<1x128xi32>
    %c0_i32 = arith.constant 0 : i32
    %10 = vector.broadcast %c0_i32 : i32 to vector<1x128xi32>
    %11 = arith.cmpi sgt, %9, %10 : vector<1x128xi32>
    %cst_9 = arith.constant -1.000000e+09 : f32
    %12 = vector.shape_cast %11 : vector<1x128xi1> to vector<1x128xi1>
    %13 = vector.broadcast %12 : vector<1x128xi1> to vector<2x128xi1>
    %14 = vector.broadcast %cst_9 : f32 to vector<2x128xf32>
    %15 = arith.select %13, %7, %14 : vector<2x128xi1>, vector<2x128xf32>
    %cst_10 = arith.constant dense<0xFF800000> : vector<2xf32>
    %16 = vector.multi_reduction <maximumf>, %15, %cst_10 [1] : vector<2x128xf32> to vector<2xf32>
    %17 = vector.shape_cast %16 : vector<2xf32> to vector<2x1xf32>
    %18 = vector.broadcast %17 : vector<2x1xf32> to vector<2x128xf32>
    %19 = arith.subf %15, %18 : vector<2x128xf32>
    %20 = math.exp %19 : vector<2x128xf32>
    %cst_11 = arith.constant dense<0.000000e+00> : vector<2xf32>
    %21 = vector.multi_reduction <add>, %20, %cst_11 [1] : vector<2x128xf32> to vector<2xf32>
    %22 = vector.shape_cast %21 : vector<2xf32> to vector<2x1xf32>
    %23 = math.log %22 : vector<2x1xf32>
    %24 = vector.broadcast %23 : vector<2x1xf32> to vector<2x128xf32>
    %25 = arith.subf %19, %24 : vector<2x128xf32>
    %c0_12 = arith.constant 0 : index
    %c0_13 = arith.constant 0 : index
    %c0_14 = arith.constant 0 : index
    %26 = vector.load %arg7[%c0_12, %c0_13, %c0_14] : memref<2x2x128xf32, #tpu.memory_space<vmem>>, vector<1x2x128xf32>
    %27 = vector.shape_cast %26 : vector<1x2x128xf32> to vector<2x128xf32>
    %28 = vector.shape_cast %25 : vector<2x128xf32> to vector<1x2x128xf32>
    tpu.vector_store %arg7[%c0_12, %c0_13, %c0_14], %28 {strides = array<i32>} : memref<2x2x128xf32, #tpu.memory_space<vmem>>, vector<1x2x128xf32>,
    %c0_15 = arith.constant 0 : index
    %c0_16 = arith.constant 0 : index
    %c0_17 = arith.constant 0 : index
    %29 = vector.load %arg5[%c0_15, %c0_16, %c0_17] : memref<2x1x8xi32, #tpu.memory_space<vmem>>, vector<1x1x8xi32>
    %30 = vector.shape_cast %29 : vector<1x1x8xi32> to vector<1x8xi32>
    %31 = vector.broadcast %30 : vector<1x8xi32> to vector<128x8xi32>
    %32 = arith.cmpi eq, %2, %31 : vector<128x8xi32>
    %33 = arith.extui %32 : vector<128x8xi1> to vector<128x8xi32>
    %34 = arith.sitofp %33 : vector<128x8xi32> to vector<128x8xf32>
    %c0_18 = arith.constant 0 : index
    %c0_19 = arith.constant 0 : index
    %c0_20 = arith.constant 0 : index
    %35 = vector.load %arg6[%c0_18, %c0_19, %c0_20] : memref<2x1x8xi32, #tpu.memory_space<vmem>>, vector<1x1x8xi32>
    %36 = vector.shape_cast %35 : vector<1x1x8xi32> to vector<1x8xi32>
    %37 = vector.broadcast %36 : vector<1x8xi32> to vector<128x8xi32>
    %38 = arith.cmpi eq, %2, %37 : vector<128x8xi32>
    %39 = arith.extui %38 : vector<128x8xi1> to vector<128x8xi32>
    %40 = arith.sitofp %39 : vector<128x8xi32> to vector<128x8xf32>
    %41 = vector.extract_strided_slice %25 {offsets = [0, 0], sizes = [1, 128], strides = [1, 1]} : vector<2x128xf32> to vector<1x128xf32>
    %cst_21 = arith.constant dense<0.000000e+00> : vector<1x8xf32>
    %42 = tpu.matmul %41, %34, %cst_21 {dimension_numbers = #tpu.dot_dimension_numbers<[1], [0], [0], [1], [0, 0, 1, 1], [], []>} : vector<1x128xf32>, vector<128x8xf32>, vector<1x8xf32> -> vector<1x8xf32>
    %43 = vector.extract_strided_slice %25 {offsets = [1, 0], sizes = [1, 128], strides = [1, 1]} : vector<2x128xf32> to vector<1x128xf32>
    %cst_22 = arith.constant dense<0.000000e+00> : vector<1x8xf32>
    %44 = tpu.matmul %43, %40, %cst_22 {dimension_numbers = #tpu.dot_dimension_numbers<[1], [0], [0], [1], [0, 0, 1, 1], [], []>} : vector<1x128xf32>, vector<128x8xf32>, vector<1x8xf32> -> vector<1x8xf32>
    %45 = arith.addf %42, %44 : vector<1x8xf32>
    %c0_23 = arith.constant 0 : index
    %c0_24 = arith.constant 0 : index
    %c0_25 = arith.constant 0 : index
    %46 = vector.load %arg8[%c0_23, %c0_24, %c0_25] : memref<2x1x8xf32, #tpu.memory_space<vmem>>, vector<1x1x8xf32>
    %47 = vector.shape_cast %46 : vector<1x1x8xf32> to vector<1x8xf32>
    %48 = vector.shape_cast %45 : vector<1x8xf32> to vector<1x1x8xf32>
    tpu.vector_store %arg8[%c0_23, %c0_24, %c0_25], %48 {strides = array<i32>} : memref<2x1x8xf32, #tpu.memory_space<vmem>>, vector<1x1x8xf32>,
    %c1 = arith.constant 1 : index
    %c0_26 = arith.constant 0 : index
    %c0_27 = arith.constant 0 : index
    %49 = vector.load %arg1[%c1, %c0_26, %c0_27] : memref<2x128x256xbf16, #tpu.memory_space<vmem>>, vector<1x128x256xbf16>
    %50 = vector.shape_cast %49 : vector<1x128x256xbf16> to vector<128x256xbf16>
    %cst_28 = arith.constant dense<0.000000e+00> : vector<2x128xf32>
    %51 = tpu.matmul %0, %50, %cst_28 {dimension_numbers = #tpu.dot_dimension_numbers<[1], [1], [0], [0], [0, 0, 1, 0], [], []>} : vector<2x256xbf16>, vector<128x256xbf16>, vector<2x128xf32> -> vector<2x128xf32>
    %52 = vector.broadcast %1 : vector<2x1xf32> to vector<2x128xf32>
    %53 = arith.addf %51, %52 : vector<2x128xf32>
    %c1_29 = arith.constant 1 : index
    %c0_30 = arith.constant 0 : index
    %c0_31 = arith.constant 0 : index
    %54 = vector.load %arg4[%c1_29, %c0_30, %c0_31] : memref<2x1x128xi32, #tpu.memory_space<vmem>>, vector<1x1x128xi32>
    %55 = vector.shape_cast %54 : vector<1x1x128xi32> to vector<1x128xi32>
    %c0_i32_32 = arith.constant 0 : i32
    %56 = vector.broadcast %c0_i32_32 : i32 to vector<1x128xi32>
    %57 = arith.cmpi sgt, %55, %56 : vector<1x128xi32>
    %cst_33 = arith.constant -1.000000e+09 : f32
    %58 = vector.shape_cast %57 : vector<1x128xi1> to vector<1x128xi1>
    %59 = vector.broadcast %58 : vector<1x128xi1> to vector<2x128xi1>
    %60 = vector.broadcast %cst_33 : f32 to vector<2x128xf32>
    %61 = arith.select %59, %53, %60 : vector<2x128xi1>, vector<2x128xf32>
    %cst_34 = arith.constant dense<0xFF800000> : vector<2xf32>
    %62 = vector.multi_reduction <maximumf>, %61, %cst_34 [1] : vector<2x128xf32> to vector<2xf32>
    %63 = vector.shape_cast %62 : vector<2xf32> to vector<2x1xf32>
    %64 = vector.broadcast %63 : vector<2x1xf32> to vector<2x128xf32>
    %65 = arith.subf %61, %64 : vector<2x128xf32>
    %66 = math.exp %65 : vector<2x128xf32>
    %cst_35 = arith.constant dense<0.000000e+00> : vector<2xf32>
    %67 = vector.multi_reduction <add>, %66, %cst_35 [1] : vector<2x128xf32> to vector<2xf32>
    %68 = vector.shape_cast %67 : vector<2xf32> to vector<2x1xf32>
    %69 = math.log %68 : vector<2x1xf32>
    %70 = vector.broadcast %69 : vector<2x1xf32> to vector<2x128xf32>
    %71 = arith.subf %65, %70 : vector<2x128xf32>
    %c1_36 = arith.constant 1 : index
    %c0_37 = arith.constant 0 : index
    %c0_38 = arith.constant 0 : index
    %72 = vector.load %arg7[%c1_36, %c0_37, %c0_38] : memref<2x2x128xf32, #tpu.memory_space<vmem>>, vector<1x2x128xf32>
    %73 = vector.shape_cast %72 : vector<1x2x128xf32> to vector<2x128xf32>
    %74 = vector.shape_cast %71 : vector<2x128xf32> to vector<1x2x128xf32>
    tpu.vector_store %arg7[%c1_36, %c0_37, %c0_38], %74 {strides = array<i32>} : memref<2x2x128xf32, #tpu.memory_space<vmem>>, vector<1x2x128xf32>,
    %c1_39 = arith.constant 1 : index
    %c0_40 = arith.constant 0 : index
    %c0_41 = arith.constant 0 : index
    %75 = vector.load %arg5[%c1_39, %c0_40, %c0_41] : memref<2x1x8xi32, #tpu.memory_space<vmem>>, vector<1x1x8xi32>
    %76 = vector.shape_cast %75 : vector<1x1x8xi32> to vector<1x8xi32>
    %77 = vector.broadcast %76 : vector<1x8xi32> to vector<128x8xi32>
    %78 = arith.cmpi eq, %2, %77 : vector<128x8xi32>
    %79 = arith.extui %78 : vector<128x8xi1> to vector<128x8xi32>
    %80 = arith.sitofp %79 : vector<128x8xi32> to vector<128x8xf32>
    %c1_42 = arith.constant 1 : index
    %c0_43 = arith.constant 0 : index
    %c0_44 = arith.constant 0 : index
    %81 = vector.load %arg6[%c1_42, %c0_43, %c0_44] : memref<2x1x8xi32, #tpu.memory_space<vmem>>, vector<1x1x8xi32>
    %82 = vector.shape_cast %81 : vector<1x1x8xi32> to vector<1x8xi32>
    %83 = vector.broadcast %82 : vector<1x8xi32> to vector<128x8xi32>
    %84 = arith.cmpi eq, %2, %83 : vector<128x8xi32>
    %85 = arith.extui %84 : vector<128x8xi1> to vector<128x8xi32>
    %86 = arith.sitofp %85 : vector<128x8xi32> to vector<128x8xf32>
    %87 = vector.extract_strided_slice %71 {offsets = [0, 0], sizes = [1, 128], strides = [1, 1]} : vector<2x128xf32> to vector<1x128xf32>
    %cst_45 = arith.constant dense<0.000000e+00> : vector<1x8xf32>
    %88 = tpu.matmul %87, %80, %cst_45 {dimension_numbers = #tpu.dot_dimension_numbers<[1], [0], [0], [1], [0, 0, 1, 1], [], []>} : vector<1x128xf32>, vector<128x8xf32>, vector<1x8xf32> -> vector<1x8xf32>
    %89 = vector.extract_strided_slice %71 {offsets = [1, 0], sizes = [1, 128], strides = [1, 1]} : vector<2x128xf32> to vector<1x128xf32>
    %cst_46 = arith.constant dense<0.000000e+00> : vector<1x8xf32>
    %90 = tpu.matmul %89, %86, %cst_46 {dimension_numbers = #tpu.dot_dimension_numbers<[1], [0], [0], [1], [0, 0, 1, 1], [], []>} : vector<1x128xf32>, vector<128x8xf32>, vector<1x8xf32> -> vector<1x8xf32>
    %91 = arith.addf %88, %90 : vector<1x8xf32>
    %c1_47 = arith.constant 1 : index
    %c0_48 = arith.constant 0 : index
    %c0_49 = arith.constant 0 : index
    %92 = vector.load %arg8[%c1_47, %c0_48, %c0_49] : memref<2x1x8xf32, #tpu.memory_space<vmem>>, vector<1x1x8xf32>
    %93 = vector.shape_cast %92 : vector<1x1x8xf32> to vector<1x8xf32>
    %94 = vector.shape_cast %91 : vector<1x8xf32> to vector<1x1x8xf32>
    tpu.vector_store %arg8[%c1_47, %c0_48, %c0_49], %94 {strides = array<i32>} : memref<2x1x8xf32, #tpu.memory_space<vmem>>, vector<1x1x8xf32>,
    return
  }
  func.func @transform_0(%arg0: i32) -> (i32, i32, i32) {
    %c0_i32 = arith.constant 0 : i32
    %c0_i32_0 = arith.constant 0 : i32
    %c0_i32_1 = arith.constant 0 : i32
    return %arg0, %c0_i32, %c0_i32_0 : i32, i32, i32
  }
  func.func @transform_1(%arg0: i32) -> (i32, i32) {
    %c0_i32 = arith.constant 0 : i32
    %c0_i32_0 = arith.constant 0 : i32
    %c0_i32_1 = arith.constant 0 : i32
    return %c0_i32, %c0_i32_0 : i32, i32
  }
  func.func @transform_2(%arg0: i32) -> (i32, i32) {
    %c0_i32 = arith.constant 0 : i32
    %c0_i32_0 = arith.constant 0 : i32
    %c0_i32_1 = arith.constant 0 : i32
    return %c0_i32, %c0_i32_0 : i32, i32
  }
  func.func @transform_3(%arg0: i32) -> (i32, i32, i32) {
    %c0_i32 = arith.constant 0 : i32
    %c0_i32_0 = arith.constant 0 : i32
    %c0_i32_1 = arith.constant 0 : i32
    return %arg0, %c0_i32, %c0_i32_0 : i32, i32, i32
  }
  func.func @transform_4(%arg0: i32) -> (i32, i32, i32) {
    %c0_i32 = arith.constant 0 : i32
    %c0_i32_0 = arith.constant 0 : i32
    %c0_i32_1 = arith.constant 0 : i32
    return %arg0, %c0_i32, %c0_i32_0 : i32, i32, i32
  }
  func.func @transform_5(%arg0: i32) -> (i32, i32, i32) {
    %c0_i32 = arith.constant 0 : i32
    %c0_i32_0 = arith.constant 0 : i32
    %c0_i32_1 = arith.constant 0 : i32
    return %arg0, %c0_i32, %c0_i32_0 : i32, i32, i32
  }
  func.func @transform_6(%arg0: i32) -> (i32, i32, i32) {
    %c0_i32 = arith.constant 0 : i32
    %c0_i32_0 = arith.constant 0 : i32
    %c0_i32_1 = arith.constant 0 : i32
    return %arg0, %c0_i32, %c0_i32_0 : i32, i32, i32
  }
  func.func @transform_7(%arg0: i32) -> (i32, i32, i32) {
    %c0_i32 = arith.constant 0 : i32
    %c0_i32_0 = arith.constant 0 : i32
    %c0_i32_1 = arith.constant 0 : i32
    return %arg0, %c0_i32, %c0_i32_0 : i32, i32, i32
  }
}

</mosaic_0001>

<bundles_post_ra>
// kernel: tpu_custom_call.1
= control target key start
LH: loop header
LB: loop body
LE: loop exit
PB: predicated region body
PF: predicated region fallthrough
CT: control target
= control target key end

     0   :  { %13 = vsyncpa [#allocation3], 0  ;;  %s2717_s0 = inlined_call_operand.hbm [shape: bf16[4,128,256], index: 0, kind: input, shape index: {}]   ;;  %s2718_s1 = inlined_call_operand.vmem [shape: bf16[2,256], index: 1, kind: input, shape index: {}]   ;;  %s2719_s2 = inlined_call_operand.vmem [shape: f32[2,1], index: 2, kind: input, shape index: {}]   ;;  %s2720_s3 = inlined_call_operand.vmem [shape: s32[4,1,128], index: 3, kind: input, shape index: {}]   ;;  %s2721_s4 = inlined_call_operand.vmem [shape: s32[4,1,8], index: 4, kind: input, shape index: {}]   ;;  %s2722_s5 = inlined_call_operand.vmem [shape: s32[4,1,8], index: 5, kind: input, shape index: {}]   ;;  %s2723_s6 = inlined_call_operand.hbm [shape: f32[4,2,128], index: 6, kind: output, shape index: {0}]   ;;  %s2724_s7 = inlined_call_operand.hbm [shape: f32[4,1,8], index: 7, kind: output, shape index: {1}]  }
   0x1   :  { %15 = vsyncpa [#allocation3 + $0x1], 0 }
   0x2   :  { %16 = vsyncpa [#allocation4], 0 }
   0x3   :  { %18 = vsyncpa [#allocation4 + $0x1], 0 }
   0x4   :  { %19 = vsyncpa [#allocation7], 0 }
   0x5   :  { %21 = vsyncpa [#allocation7 + $0x1], 0  ;;  %s2235_s24 = smov 0   ;;  %s2237_s25 = smov 0  }
   0x6   :  { %s2239_s26 = smov 0   ;;  %s2241_s27 = smov 0  }
   0x7 LB: > { %s2256_s28 = sadd.s32 4294967295, %s2178_s27   ;;  %s1410_s29 = sadd.s32 4294967294, %s2178_s27   ;;  %s2178_s27 = sphi %s2241_s27, %s2737_s27   ;;  %s2174_s26 = sphi %s2239_s26, %s2736_s26   ;;  %s2170_s25 = sphi %s2237_s25, %s2735_s25   ;;  %s2166_s24 = sphi %s2235_s24, %s2734_s24  }
   0x8   : > { %s2260_s30 = sadd.s32 1, %s2178_s27   ;;  %s34_s8 = sadd.s32 1, %s2174_s26 }
   0x9   : > { %s31_s9 = ssub.s32 %s2178_s27, %s2260_s30  ;;  %p41_p0 = scmp.ne.s32.totalorder %s2174_s26, %s2170_s25 }
   0xa   : > { %p32_p1 = scmp.eq.s32.totalorder %s31_s9, 0  ;;  %p42_p2 = scmp.eq.s32.totalorder %s2178_s27, 0 }
   0xb   : > { %p47_p3 = scmp.ne.s32.totalorder %s2170_s25, %s2166_s24  ;;  %p48_p4 = scmp.eq.s32.totalorder %s2256_s28, 0 }
   0xc   : > { %s2272_s10 = scalar_select %p32_p1, %s2174_s26, %s34_s8  }
   0xd   : > { %p2274_p5 = por %p42_p2, %p41_p0  ;;  %p2278_p6 = por %p48_p4, %p47_p3 }
   0xe   : > { %p191_p7 = scmp.eq.s32.totalorder %s2256_s28, 1  ;;  %p197_p8 = scmp.eq.s32.totalorder %s1410_s29, 1 }
   0xf   : > { %p1947_p10 = scmp.lt.s32.totalorder %s2178_s27, 2  ;;  %s249_s15 = sand.u32 1, %s2174_s26  }
  0x10   : > { %p2285_p11 = por %p191_p7, %p41_p0  ;;  %p2289_p12 = por %p197_p8, %p47_p3 }
  0x11   : > { %s1619_s16 = sshll.u32 %s2178_s27, 12  ;;  %s1413_s17 = sshll.u32 %s249_s15, 8 }
  0x12   : > { %s2728_s13 = scalar_select %p2285_p11, 1, 0 }
  0x13   : > { %s2729_s14 = scalar_select %p2289_p12, 1, 0 }
  0x14   : > { %s2298_s20 = scalar_lea.hbm %s2717_s0, %s1619_s16  ;;  %s253_s21 = scalar_lea.vmem [#allocation2], %s1413_s17 }
  0x15   : > { %s261_s22 = sshll.u32 %s253_s21, 4  ;;  %p2302_p13 = pnand %p1947_p10, %p2274_p5  ;;  %s2306_s22 = int_to_ptr.vmem [resolvable:$true] %s261_s22 }
  0x16   : > { %s2308_s29 = scalar_lea.sflag [#allocation3], %s249_s15  ;;  %s2050_s8 = scalar_lea.hbm %s2298_s20, 4096 }
  0x17   : > { %p2051_p0 = scmp.ne.s32.totalorder %s2298_s20, %s2050_s8  ;;  %p2052_p1 = pneg %p2302_p13 }
  0x18   : > { %s2055_s16 = scalar_lea.hbm %s2717_s0, 8192  ;;  %p2056_p4 = scmp.lt.u32.totalorder %s2298_s20, %s2717_s0 }
  0x19   : > { %p2053_p2 = pnand %p2052_p1, %p2051_p0  ;;  %p2057_p5 = scmp.lt.u32.totalorder %s2055_s16, %s2050_s8 }
  0x1a   : > { %p2059_p8 = scmp.lt.u32.totalorder %s2050_s8, %s2298_s20 }
  0x1b   : > { %p2054_p3 = pneg %p2053_p2  ;;  %p2058_p7 = por %p2057_p5, %p2056_p4 }
  0x1d   : > { %p2060_p10 = por %p2059_p8, %p2058_p7 }
  0x1f   : > { %p2061_p9 = pnand %p2060_p10, %p2054_p3 }
  0x21   : > { %2064 = shalt.err (!%p2061_p9)
}
  0x22   : > { %s2065_s15 = scalar_lea.vmem %s2306_s22, 4096  ;;  %s2180_s19 = smov [#allocation2]  }
  0x23   : > { %p2066_p0 = scmp.ne.s32.totalorder %s2306_s22, %s2065_s15  ;;  %s2070_s21 = sshll.u32 %s2180_s19, 4  ;;  %s2071_s21 = int_to_ptr.vmem [resolvable:$false] %s2070_s21 }
  0x24   : > { %s2072_s9 = scalar_lea.vmem %s2071_s21, 8192  ;;  %p2073_p11 = scmp.lt.s32.totalorder %s2306_s22, %s2071_s21 }
  0x25   : > { %p2068_p2 = pnand %p2066_p0, %p2052_p1  ;;  %p2074_p4 = scmp.lt.s32.totalorder %s2072_s9, %s2065_s15 }
  0x27   : > { %p2069_p12 = pneg %p2068_p2  ;;  %p2075_p5 = por %p2074_p4, %p2073_p11 }
  0x29   : > { %p2076_p7 = pnand %p2075_p5, %p2069_p12 }
  0x2b   : > { %2079 = shalt.err (!%p2076_p7)
}
  0x2c   : > { %s2181_s8 = smov 128   ;;  %s2182_s11 = smov 8  }
  0x2d   : > { %1939 = dma.hbm_to_vmem [thread:$0]  (!%p2302_p13), %s2298_s20, 4096, %s2306_s22, %s2308_s29, %s2181_s8, %s2181_s8, %s2182_s11  }
  0x2e   : > { %p1417_p9 = scmp.ge.s32.totalorder %s2178_s27, 1  ;;  %p293_p1 = scmp.lt.s32.totalorder %s2178_s27, 3 }
  0x30   : > { %p294_p3 = pnand %p1417_p9, %p293_p1 }
  0x31   : > { %s2339_s16 = sand.u32 (!%p294_p3), 1, %s2170_s25  }
  0x32   : > { %297 = sbr.rel (%p294_p3) target bundleno = 979 (0x3d3), region = 44  ;;  %s1418_s17 = sshll.u32 (!%p294_p3), %s2339_s16, 8 }
  0x33   : > { %s300_s18 = scalar_lea.sflag (!%p294_p3), [#allocation3], %s2339_s16  ;;  %s2343_s15 = scalar_lea.vmem (!%p294_p3), [#allocation2], %s1418_s17 }
  0x39   : > { %2153 = dma.done.wait (%p2278_p6), %s300_s18, 4096  }
  0x3a   : > { %2155 = vsyncadd (%p2278_p6), %s300_s18, 4294963200  ;;  %v1994_v0 = vld [vmem:[%s2343_s15 + $0x4] ss:$8 sps:$4 sm:$0xff]   ;;  %v1996_v1 = vld [vmem:[%s2343_s15] ss:$8 sps:$4 sm:$0xff]   ;;  %v372_v3 = vlaneseq  ;;  %v2184_v6 = vmov 0  }
  0x3b   : > { %515 = vmatprep.subr.bf16.mxu0 %v1994_v0  ;;  %v1997_v2 = vld [vmem:[%s2343_s15 + $0x14] ss:$8 sps:$4 sm:$0xff]   ;;  %v2183_v4 = vmov 1966171168   ;;  %1993 = vset.pattern.permute.xlu0 %v2184_v6  ;;  %v1999_v9 = vld [vmem:[%s2343_s15 + $0x10] ss:$8 sps:$4 sm:$0xff]  }
  0x3c   : > { %v420_v5 = vunpack.c.l.s4 %v2183_v4  ;;  %516 = vmatpush1.bf16.xpose.msra.mxu0 %v1996_v1  ;;  %v2353_v7 = vshrl.u32 %v372_v3, 7  ;;  %v2000_v10 = vld [vmem:[%s2343_s15 + $0x24] ss:$8 sps:$4 sm:$0xff]   ;;  %v2002_v15 = vld [vmem:[%s2343_s15 + $0x20] ss:$8 sps:$4 sm:$0xff]   ;;  %s1421_s29 = sshll.u32 %s2256_s28, 1 }
  0x3d   : > { %517 = vmatprep.subr.bf16.mxu0 %v1997_v2  ;;  %v1424_v12 = vld.sshfl [vmem:[%s2718_s1] sm:$0x11 pattern:$0x75316420]  ;;  %v2003_v16 = vld [vmem:[%s2343_s15 + $0x34] ss:$8 sps:$4 sm:$0xff]  }
  0x3e   : > { %v421_v8 = vunpack.c.0.s8 %v420_v5  ;;  %v418_v13 = vcombine.high %v1424_v12, %v1424_v12  ;;  %v371_v17 = vld [vmem:[%s2719_s2] sm:$0x3]  ;;  %v2005_v18 = vld [vmem:[%s2343_s15 + $0x30] ss:$8 sps:$4 sm:$0xff]   ;;  %v2006_v19 = vld [vmem:[%s2343_s15 + $0x44] ss:$8 sps:$4 sm:$0xff]  }
  0x3f   : > { %407 = vperm.xlu0 %1993, %v371_v17   ;;  %v2008_v20 = vld [vmem:[%s2343_s15 + $0x40] ss:$8 sps:$4 sm:$0xff]   ;;  %v2009_v21 = vld [vmem:[%s2343_s15 + $0x54] ss:$8 sps:$4 sm:$0xff]   ;;  %v2011_v22 = vld [vmem:[%s2343_s15 + $0x50] ss:$8 sps:$4 sm:$0xff]  }
  0x40   : > { %v424_v11 = vsub.s32 %v421_v8, %v2353_v7  ;;  %v2012_v23 = vld [vmem:[%s2343_s15 + $0x64] ss:$8 sps:$4 sm:$0xff]   ;;  %v2014_v24 = vld [vmem:[%s2343_s15 + $0x60] ss:$8 sps:$4 sm:$0xff]   ;;  %v2015_v25 = vld [vmem:[%s2343_s15 + $0x74] ss:$8 sps:$4 sm:$0xff]  }
  0x41   : > { %v2017_v26 = vld [vmem:[%s2343_s15 + $0x70] ss:$8 sps:$4 sm:$0xff]   ;;  %v2020_v27 = vld [vmem:[%s2343_s15 + $0x84] ss:$8 sps:$4 sm:$0xff]   ;;  %v2018_v29 = vld [vmem:[%s2343_s15 + $0x80] ss:$8 sps:$4 sm:$0xff]  }
  0x42   : > { %v432_v14 = vrot.slane %v418_v13, %v424_v11  ;;  %v425_v28 = vrot.slane %v1424_v12, %v424_v11  ;;  %v2023_v30 = vld [vmem:[%s2343_s15 + $0x94] ss:$8 sps:$4 sm:$0xff]   ;;  %v2021_v31 = vld [vmem:[%s2343_s15 + $0x90] ss:$8 sps:$4 sm:$0xff]   ;;  %v2026_v32 = vld [vmem:[%s2343_s15 + $0xa4] ss:$8 sps:$4 sm:$0xff]  }
  0x43   : > { %v2024_v33 = vld [vmem:[%s2343_s15 + $0xa0] ss:$8 sps:$4 sm:$0xff]   ;;  %v2029_v34 = vld [vmem:[%s2343_s15 + $0xb4] ss:$8 sps:$4 sm:$0xff]   ;;  %v2027_v35 = vld [vmem:[%s2343_s15 + $0xb0] ss:$8 sps:$4 sm:$0xff]  }
  0x44   : > { %518 = vmatpush1.bf16.xpose.msra.mxu0 %v1999_v9  ;;  %547 = vmatprep.mubr.bf16.mxu0 %v432_v14  ;;  %v2032_v36 = vld [vmem:[%s2343_s15 + $0xc4] ss:$8 sps:$4 sm:$0xff]   ;;  %v2030_v37 = vld [vmem:[%s2343_s15 + $0xc0] ss:$8 sps:$4 sm:$0xff]   ;;  %v2035_v38 = vld [vmem:[%s2343_s15 + $0xd4] ss:$8 sps:$4 sm:$0xff]  }
  0x45   : > { %519 = vmatprep.subr.bf16.mxu0 %v2000_v10  ;;  %v2033_v39 = vld [vmem:[%s2343_s15 + $0xd0] ss:$8 sps:$4 sm:$0xff]   ;;  %v2038_v40 = vld [vmem:[%s2343_s15 + $0xe4] ss:$8 sps:$4 sm:$0xff]   ;;  %v2036_v41 = vld [vmem:[%s2343_s15 + $0xe0] ss:$8 sps:$4 sm:$0xff]  }
  0x46   : > { %v2041_v42 = vld [vmem:[%s2343_s15 + $0xf4] ss:$8 sps:$4 sm:$0xff]   ;;  %v2039_v43 = vld [vmem:[%s2343_s15 + $0xf0] ss:$8 sps:$4 sm:$0xff]   ;;  %p353_p6 = scmp.lt.s32.totalorder %s1421_s29, 3  ;;  %v560_v45 = vsub.s32 0, %v2353_v7 }
  0x47   : > { %vm564_vm3 = vcmask 1041408   ;;  %v2416_v3 = vadd.s32 8, %v2353_v7  ;;  %v2185_v4 = vmov 0.0|0.0   ;;  %v2422_v5 = vadd.s32 16, %v2353_v7  ;;  %s1419_s20 = sshll.u32 %s2339_s16, 2  ;;  %s1244_s8 = scalar_lea.sflag [#allocation4], %s2339_s16 }
  0x48   : > { %s2739_s29 = smov (!%p353_p6, %s1421_s29), 3  ;;  %1830 = vmatprep.subr.bf16.mxu1 %v2185_v4  ;;  %v2430_v8 = vadd.s32 32, %v2353_v7  ;;  %v2433_v9 = vadd.s32 40, %v2353_v7  ;;  %v2186_v10 = vmov 1.0|1.0   ;;  %v2446_v11 = vadd.s32 48, %v2353_v7 }
  0x49   : > { %s355_s9 = scalar_lea.vmem %s2720_s3, %s2739_s29  ;;  %s2410_s17 = scalar_lea.vmem %s2722_s5, %s2739_s29  ;;  %v2449_v12 = vadd.s32 56, %v2353_v7 }
  0x4a   : > { %v1539_v44 = vld [vmem:[%s355_s9 + $0x1] sm:$0x1]  ;;  %v555_v48 = vld [vmem:[%s355_s9] sm:$0x1]  ;;  %s2521_s12 = scalar_lea.vmem %s2721_s4, %s2739_s29  ;;  %s2527_s22 = scalar_lea.vmem [#allocation5], %s1419_s20 }
  0x4b   : > { %vm968_vm0 = vcmp.gt.s32.totalorder %v1539_v44, 0  ;;  %vm556_vm1 = vcmp.gt.s32.totalorder %v555_v48, 0  ;;  %v2413_v2 = vld [vmem:[%s2410_s17] ss:$0 sm:$0xff]  ;;  %s1262_s23 = sshll.u32 %s2527_s22, 4  ;;  %s1620_s29 = sshll.u32 %s2256_s28, 6  ;;  %s2634_s23 = int_to_ptr.vmem [resolvable:$true] %s1262_s23 }
  0x4c   : > { %520 = vmatpush1.bf16.xpose.msra.mxu0 %v2002_v15  ;;  %v969_v46 = vsel %vm968_vm0, 1, %v2184_v6  ;;  %v557_v49 = vsel %vm556_vm1, 1, %v2184_v6  ;;  %vm636_vm5 = vcmp.eq.s32.totalorder %v2353_v7, %v2413_v2  ;;  %v2425_v6 = vadd.s32 24, %v2353_v7  ;;  %s2640_s9 = scalar_lea.hbm %s2723_s6, %s1620_s29  ;;  %s2080_s11 = scalar_lea.vmem %s2634_s23, 64 }
  0x4d   : > { %521 = vmatprep.subr.bf16.mxu0 %v2003_v16  ;;  %v973_v47 = vrot.slane %v969_v46, %v560_v45  ;;  %v561_v50 = vrot.slane %v557_v49, %v560_v45  ;;  %vm637_vm6 = vcmp.eq.s32.totalorder %v2416_v3, %v2413_v2  ;;  %vm638_vm8 = vcmp.eq.s32.totalorder %v2422_v5, %v2413_v2  ;;  %p2081_p11 = scmp.ne.s32.totalorder %s2634_s23, %s2080_s11  ;;  %p2731_p12 = scmp.ne.s32.totalorder %s2728_s13, 0 }
  0x4e   : > { %vm1831_vm7 = vmpackc.low %vm637_vm6, %vm636_vm5  ;;  %vm639_vm9 = vcmp.eq.s32.totalorder %v2425_v6, %v2413_v2  ;;  %vm640_vm11 = vcmp.eq.s32.totalorder %v2430_v8, %v2413_v2  ;;  %vm641_vm12 = vcmp.eq.s32.totalorder %v2433_v9, %v2413_v2  ;;  %vm642_vm14 = vcmp.eq.s32.totalorder %v2446_v11, %v2413_v2 }
  0x4f   : > { %vm562_vm2 = vcmp.eq.s32.totalorder %v561_v50, 1  ;;  %vm974_vm4 = vcmp.eq.s32.totalorder %v973_v47, 1  ;;  %1832 = vmatpush3.bf16.msk.msra.mxu1 %vm1831_vm7, %v2186_v10  ;;  %vm1834_vm10 = vmpackc.low %vm639_vm9, %vm638_vm8  ;;  %vm643_vm15 = vcmp.eq.s32.totalorder %v2449_v12, %v2413_v2  ;;  %p2082_p13 = pnand %p2081_p11, %p2731_p12 }
  0x50   : > { %1833 = vmatprep.subr.bf16.mxu1 %v2185_v4  ;;  %vm1837_vm13 = vmpackc.low %vm641_vm12, %vm640_vm11 }
  0x51   : > { %vm1840_vm0 = vmpackc.low %vm643_vm15, %vm642_vm14  ;;  %vm2187_vm14 = vmmov 0   ;;  %p2083_p8 = pneg %p2082_p13 }
  0x53   : > { %1835 = vmatpush3.bf16.msk.msra.mxu1 %vm1834_vm10, %v2186_v10 }
  0x54   : > { %522 = vmatpush1.bf16.xpose.msra.mxu0 %v2005_v18  ;;  %1836 = vmatprep.subr.bf16.mxu1 %v2185_v4  ;;  %v2463_v18 = vadd.s32 64, %v2353_v7 }
  0x55   : > { %523 = vmatprep.subr.bf16.mxu0 %v2006_v19  ;;  %v2466_v19 = vadd.s32 72, %v2353_v7 }
  0x56   : > { %vm644_vm1 = vcmp.eq.s32.totalorder %v2463_v18, %v2413_v2 }
  0x57   : > { %1838 = vmatpush3.bf16.msk.msra.mxu1 %vm1837_vm13, %v2186_v10 }
  0x58   : > { %1839 = vmatprep.subr.bf16.mxu1 %v2185_v4 }
  0x5b   : > { %1841 = vmatpush3.bf16.msk.msra.mxu1 %vm1840_vm0, %v2186_v10 }
  0x5c   : > { %524 = vmatpush1.bf16.xpose.msra.mxu0 %v2008_v20  ;;  %1842 = vmatprep.subr.bf16.mxu1 %v2185_v4  ;;  %v2474_v20 = vadd.s32 80, %v2353_v7 }
  0x5d   : > { %525 = vmatprep.subr.bf16.mxu0 %v2009_v21  ;;  %v2477_v21 = vadd.s32 88, %v2353_v7 }
  0x5e   : > { %vm646_vm5 = vcmp.eq.s32.totalorder %v2474_v20, %v2413_v2 }
  0x5f   : > { %vm647_vm6 = vcmp.eq.s32.totalorder %v2477_v21, %v2413_v2 }
  0x60   : > { %vm1846_vm7 = vmpackc.low %vm647_vm6, %vm646_vm5 }
  0x64   : > { %526 = vmatpush1.bf16.xpose.msra.mxu0 %v2011_v22  ;;  %v2486_v22 = vadd.s32 96, %v2353_v7 }
  0x65   : > { %527 = vmatprep.subr.bf16.mxu0 %v2012_v23  ;;  %v2489_v23 = vadd.s32 104, %v2353_v7 }
  0x66   : > { %vm648_vm8 = vcmp.eq.s32.totalorder %v2486_v22, %v2413_v2 }
  0x67   : > { %vm649_vm9 = vcmp.eq.s32.totalorder %v2489_v23, %v2413_v2 }
  0x68   : > { %vm1849_vm10 = vmpackc.low %vm649_vm9, %vm648_vm8 }
  0x6c   : > { %528 = vmatpush1.bf16.xpose.msra.mxu0 %v2014_v24  ;;  %v2498_v24 = vadd.s32 112, %v2353_v7 }
  0x6d   : > { %529 = vmatprep.subr.bf16.mxu0 %v2015_v25  ;;  %v2501_v25 = vadd.s32 120, %v2353_v7 }
  0x6e   : > { %vm650_vm11 = vcmp.eq.s32.totalorder %v2498_v24, %v2413_v2 }
  0x6f   : > { %vm651_vm12 = vcmp.eq.s32.totalorder %v2501_v25, %v2413_v2 }
  0x70   : > { %vm1852_vm13 = vmpackc.low %vm651_vm12, %vm650_vm11 }
  0x74   : > { %530 = vmatpush1.bf16.xpose.msra.mxu0 %v2017_v26  ;;  %v2188_v26 = vmov 0.0  }
  0x75   : > { %926 = vmatprep.subr.bf16.mxu0 %v2020_v27  ;;  %1722 = vmatprep.mubr.msk.f32.mxu1 %vm2187_vm14, %v2188_v26 }
  0x7b   : > { %548 = vmatmul.mubr.bf16.vlgmr.msra.gmra.mrb[0].mxu0 %v425_v28 }
  0x7c   : > { %927 = vmatpush1.bf16.xpose.msra.mxu0 %v2018_v29  ;;  %958 = vmatprep.mubr.bf16.mxu0 %v432_v14 }
  0x7d   : > { %928 = vmatprep.subr.bf16.mxu0 %v2023_v30 }
  0x84   : > { %929 = vmatpush1.bf16.xpose.msra.mxu0 %v2021_v31 }
  0x85   : > { %930 = vmatprep.subr.bf16.mxu0 %v2026_v32 }
  0x8c   : > { %931 = vmatpush1.bf16.xpose.msra.mxu0 %v2024_v33  ;;  %v1441_v33 = vld [vmem:[%s2521_s12] ss:$0 sm:$0xff] }
  0x8d   : > { %932 = vmatprep.subr.bf16.mxu0 %v2029_v34  ;;  %vm583_vm15 = vcmp.eq.s32.totalorder %v2353_v7, %v1441_v33  ;;  %vm584_vm0 = vcmp.eq.s32.totalorder %v2416_v3, %v1441_v33  ;;  %vm587_vm5 = vcmp.eq.s32.totalorder %v2430_v8, %v1441_v33  ;;  %vm588_vm6 = vcmp.eq.s32.totalorder %v2433_v9, %v1441_v33 }
  0x8e   : > { %vm589_vm8 = vcmp.eq.s32.totalorder %v2446_v11, %v1441_v33  ;;  %vm590_vm9 = vcmp.eq.s32.totalorder %v2449_v12, %v1441_v33  ;;  %vm591_vm11 = vcmp.eq.s32.totalorder %v2463_v18, %v1441_v33  ;;  %vm592_vm12 = vcmp.eq.s32.totalorder %v2466_v19, %v1441_v33 }
  0x94   : > { %933 = vmatpush1.bf16.xpose.msra.mxu0 %v2027_v35 }
  0x95   : > { %934 = vmatprep.subr.bf16.mxu0 %v2032_v36 }
  0x9c   : > { %935 = vmatpush1.bf16.xpose.msra.mxu0 %v2030_v37 }
  0x9d   : > { %936 = vmatprep.subr.bf16.mxu0 %v2035_v38  ;;  %v1560_v38 = vld [vmem:[%s2410_s17 + $0x1] ss:$0 sm:$0xff]  ;;  %s2189_s17 = smov [#allocation5]  }
  0x9e   : > { %s2084_s18 = sshll.u32 %s2189_s17, 4  ;;  %s2085_s18 = int_to_ptr.vmem [resolvable:$false] %s2084_s18 }
  0x9f   : > { %s2086_s15 = scalar_lea.vmem %s2085_s18, 128  ;;  %p2087_p10 = scmp.lt.s32.totalorder %s2634_s23, %s2085_s18 }
  0xa0   : > { %p2088_p0 = scmp.lt.s32.totalorder %s2086_s15, %s2080_s11 }
  0xa2   : > { %p2089_p2 = por %p2088_p0, %p2087_p10 }
  0xa4   : > { %937 = vmatpush1.bf16.xpose.msra.mxu0 %v2033_v39  ;;  %p2090_p4 = pnand %p2089_p2, %p2083_p8 }
  0xa5   : > { %938 = vmatprep.subr.bf16.mxu0 %v2038_v40  ;;  %v1542_v40 = vld [vmem:[%s2521_s12 + $0x1] ss:$0 sm:$0xff] }
  0xac   : > { %939 = vmatpush1.bf16.xpose.msra.mxu0 %v2036_v41 }
  0xad   : > { %940 = vmatprep.subr.bf16.mxu0 %v2041_v42 }
  0xb4   : > { %941 = vmatpush1.bf16.xpose.msra.mxu0 %v2039_v43 }
  0xbb   : > { %959 = vmatmul.mubr.bf16.vlgmr.msra.gmra.mrb[4].mxu0 %v425_v28 }
  0xbe   : > { %v408_v51 = vpop.permute.xlu0 %407 }
 0x14e   : > { %v549_v52 = vpop.f32.mrb[0].mxu0 }
 0x14f   : > { %v550_v53 = vadd.f32 %v549_v52, %v408_v51  ;;  %v551_v54 = vpop.f32.mrb[1].mxu0 }
 0x150   : > { %v552_v55 = vpop.f32.mrb[2].mxu0 }
 0x151   : > { %v553_v56 = vpop.f32.mrb[3].mxu0  ;;  %v563_v57 = vsel %vm562_vm2, %v550_v53, -1e+09  ;;  %vm645_vm2 = vcmp.eq.s32.totalorder %v2466_v19, %v2413_v2 }
 0x152   : > { %v565_v58 = vsel %vm564_vm3, %v563_v57, -inf }
 0x153   : > { %566 = vmax.xlane.f32.xlu0 %v565_v58 }
 0x18e   : > { %v960_v59 = vpop.f32.mrb[4].mxu0 }
 0x18f   : > { %v961_v60 = vadd.f32 %v960_v59, %v408_v51  ;;  %v962_v61 = vpop.f32.mrb[5].mxu0 }
 0x190   : > { %v963_v62 = vpop.f32.mrb[6].mxu0 }
 0x191   : > { %v964_v63 = vpop.f32.mrb[7].mxu0  ;;  %v2402_v0 = vsel %vm974_vm4, %v961_v60, -1e+09  ;;  %vm1843_vm4 = vmpackc.low %vm645_vm2, %vm644_vm1  ;;  %vm585_vm1 = vcmp.eq.s32.totalorder %v2422_v5, %v1441_v33  ;;  %vm586_vm2 = vcmp.eq.s32.totalorder %v2425_v6, %v1441_v33 }
 0x192   : > { %v976_v1 = vsel %vm564_vm3, %v2402_v0, -inf  ;;  %1844 = vmatpush3.bf16.msk.msra.mxu1 %vm1843_vm4, %v2186_v10  ;;  %vm1858_vm4 = vmpackc.low %vm586_vm2, %vm585_vm1  ;;  %vm595_vm1 = vcmp.eq.s32.totalorder %v2486_v22, %v1441_v33  ;;  %vm596_vm2 = vcmp.eq.s32.totalorder %v2489_v23, %v1441_v33 }
 0x193   : > { %977 = vmax.xlane.f32.xlu1 %v976_v1  ;;  %1845 = vmatprep.subr.bf16.mxu1 %v2185_v4 }
 0x196   : > { %1847 = vmatpush3.bf16.msk.msra.mxu1 %vm1846_vm7, %v2186_v10  ;;  %vm1861_vm7 = vmpackc.low %vm588_vm6, %vm587_vm5  ;;  %vm597_vm5 = vcmp.eq.s32.totalorder %v2498_v24, %v1441_v33  ;;  %vm598_vm6 = vcmp.eq.s32.totalorder %v2501_v25, %v1441_v33 }
 0x197   : > { %1848 = vmatprep.subr.bf16.mxu1 %v2185_v4 }
 0x19a   : > { %1850 = vmatpush3.bf16.msk.msra.mxu1 %vm1849_vm10, %v2186_v10  ;;  %vm1864_vm10 = vmpackc.low %vm590_vm9, %vm589_vm8  ;;  %vm1050_vm8 = vcmp.eq.s32.totalorder %v2353_v7, %v1560_v38  ;;  %vm1051_vm9 = vcmp.eq.s32.totalorder %v2416_v3, %v1560_v38 }
 0x19b   : > { %1851 = vmatprep.subr.bf16.mxu1 %v2185_v4 }
 0x19e   : > { %1853 = vmatpush3.bf16.msk.msra.mxu1 %vm1852_vm13, %v2186_v10  ;;  %vm1867_vm13 = vmpackc.low %vm592_vm12, %vm591_vm11  ;;  %vm1052_vm11 = vcmp.eq.s32.totalorder %v2422_v5, %v1560_v38  ;;  %vm1053_vm12 = vcmp.eq.s32.totalorder %v2425_v6, %v1560_v38 }
 0x19f   : > { %1854 = vmatprep.subr.bf16.mxu1 %v2185_v4 }
 0x1e0   : > { %v567_v13 = vpop.xlane.xlu0 %566 }
 0x1e1   : > { %v568_v14 = vsub.f32 %v563_v57, %v567_v13 }
 0x1e3   : > { %v569_v15 = vmul.f32 1.442695, %v568_v14 }
 0x1e5   : > { %2042 = vpow2.f32 %v569_v15 }
 0x1ef   : > { %v2043_v16 = vpop.eup %2042 }
 0x1f0   : > { %v571_v17 = vsel %vm564_vm3, %v2043_v16, 0.0 }
 0x1f1   : > { %572 = vadd.xlane.f32.xlu1 %v571_v17 }
 0x220   : > { %v978_v27 = vpop.xlane.xlu1 %977 }
 0x221   : > { %v2513_v28 = vsub.f32 %v2402_v0, %v978_v27 }
 0x223   : > { %v980_v29 = vmul.f32 1.442695, %v2513_v28 }
 0x225   : > { %2044 = vpow2.f32 %v980_v29 }
 0x22f   : > { %v2045_v30 = vpop.eup %2044 }
 0x230   : > { %v982_v31 = vsel %vm564_vm3, %v2045_v30, 0.0  ;;  %vm1855_vm3 = vmpackc.low %vm584_vm0, %vm583_vm15  ;;  %vm593_vm15 = vcmp.eq.s32.totalorder %v2474_v20, %v1441_v33  ;;  %vm594_vm0 = vcmp.eq.s32.totalorder %v2477_v21, %v1441_v33 }
 0x231   : > { %983 = vadd.xlane.f32.xlu1 %v982_v31 }
 0x27e   : > { %v573_v32 = vpop.xlane.xlu1 %572 }
 0x27f   : > { %2046 = vlog2.f32 %v573_v32 }
 0x289   : > { %v2047_v34 = vpop.eup %2046 }
 0x28a   : > { %v575_v35 = vmul.f32 0.6931472, %v2047_v34 }
 0x28c   : > { %v576_v36 = vsub.f32 %v568_v14, %v575_v35 }
 0x28e   : > { %577 = vst [vmem:[%s2527_s22] sm:$0x3] %v576_v36  ;;  %v685_v37 = vrot.slane %v576_v36, 1 }
 0x290   : > { %1723 = vmatmul.mubr.f32.vlgmr.msra.gmra.mrb[0].mxu1 %v685_v37 }
 0x291   : > { %1856 = vmatpush3.bf16.msk.msra.mxu1 %vm1855_vm3, %v2186_v10  ;;  %1757 = vmatprep.mubr.msk.f32.mxu1 %vm2187_vm14, %v2188_v26  ;;  %vm1870_vm3 = vmpackc.low %vm594_vm0, %vm593_vm15  ;;  %vm1054_vm15 = vcmp.eq.s32.totalorder %v2430_v8, %v1560_v38  ;;  %vm1055_vm0 = vcmp.eq.s32.totalorder %v2433_v9, %v1560_v38 }
 0x292   : > { %1857 = vmatprep.subr.bf16.mxu1 %v2185_v4 }
 0x295   : > { %1859 = vmatpush3.bf16.msk.msra.mxu1 %vm1858_vm4, %v2186_v10  ;;  %vm1873_vm4 = vmpackc.low %vm596_vm2, %vm595_vm1  ;;  %vm1056_vm1 = vcmp.eq.s32.totalorder %v2446_v11, %v1560_v38  ;;  %vm1057_vm2 = vcmp.eq.s32.totalorder %v2449_v12, %v1560_v38 }
 0x296   : > { %1860 = vmatprep.subr.bf16.mxu1 %v2185_v4 }
 0x299   : > { %1862 = vmatpush3.bf16.msk.msra.mxu1 %vm1861_vm7, %v2186_v10  ;;  %vm1876_vm7 = vmpackc.low %vm598_vm6, %vm597_vm5  ;;  %vm1058_vm5 = vcmp.eq.s32.totalorder %v2463_v18, %v1560_v38  ;;  %vm1059_vm6 = vcmp.eq.s32.totalorder %v2466_v19, %v1560_v38 }
 0x29a   : > { %1863 = vmatprep.subr.bf16.mxu1 %v2185_v4 }
 0x29d   : > { %1865 = vmatpush3.bf16.msk.msra.mxu1 %vm1864_vm10, %v2186_v10  ;;  %vm1879_vm10 = vmpackc.low %vm1051_vm9, %vm1050_vm8  ;;  %vm1060_vm8 = vcmp.eq.s32.totalorder %v2474_v20, %v1560_v38  ;;  %vm1061_vm9 = vcmp.eq.s32.totalorder %v2477_v21, %v1560_v38 }
 0x29e   : > { %1866 = vmatprep.subr.bf16.mxu1 %v2185_v4 }
 0x2a1   : > { %1868 = vmatpush3.bf16.msk.msra.mxu1 %vm1867_vm13, %v2186_v10  ;;  %vm1882_vm13 = vmpackc.low %vm1053_vm12, %vm1052_vm11  ;;  %vm1062_vm11 = vcmp.eq.s32.totalorder %v2486_v22, %v1560_v38  ;;  %vm1063_vm12 = vcmp.eq.s32.totalorder %v2489_v23, %v1560_v38 }
 0x2a2   : > { %1869 = vmatprep.subr.bf16.mxu1 %v2185_v4 }
 0x2a5   : > { %1871 = vmatpush3.bf16.msk.msra.mxu1 %vm1870_vm3, %v2186_v10  ;;  %vm1885_vm3 = vmpackc.low %vm1055_vm0, %vm1054_vm15  ;;  %vm1064_vm15 = vcmp.eq.s32.totalorder %v2498_v24, %v1560_v38  ;;  %vm1065_vm0 = vcmp.eq.s32.totalorder %v2501_v25, %v1560_v38 }
 0x2a6   : > { %1872 = vmatprep.subr.bf16.mxu1 %v2185_v4 }
 0x2a9   : > { %1874 = vmatpush3.bf16.msk.msra.mxu1 %vm1873_vm4, %v2186_v10  ;;  %vm1888_vm4 = vmpackc.low %vm1057_vm2, %vm1056_vm1  ;;  %vm996_vm1 = vcmp.eq.s32.totalorder %v2353_v7, %v1542_v40  ;;  %vm997_vm2 = vcmp.eq.s32.totalorder %v2416_v3, %v1542_v40 }
 0x2aa   : > { %1875 = vmatprep.subr.bf16.mxu1 %v2185_v4 }
 0x2ad   : > { %1877 = vmatpush3.bf16.msk.msra.mxu1 %vm1876_vm7, %v2186_v10  ;;  %vm1891_vm7 = vmpackc.low %vm1059_vm6, %vm1058_vm5  ;;  %vm998_vm5 = vcmp.eq.s32.totalorder %v2422_v5, %v1542_v40  ;;  %vm999_vm6 = vcmp.eq.s32.totalorder %v2425_v6, %v1542_v40 }
 0x2ae   : > { %1878 = vmatprep.subr.bf16.mxu1 %v2185_v4 }
 0x2b0   : > { %1758 = vmatmul.mubr.f32.vlgmr.msra.gmra.mrb[0].mxu1 %v576_v36 }
 0x2b1   : > { %1880 = vmatpush3.bf16.msk.msra.mxu1 %vm1879_vm10, %v2186_v10  ;;  %1792 = vmatprep.mubr.msk.f32.mxu1 %vm2187_vm14, %v2188_v26  ;;  %vm1894_vm10 = vmpackc.low %vm1061_vm9, %vm1060_vm8  ;;  %vm1000_vm8 = vcmp.eq.s32.totalorder %v2430_v8, %v1542_v40  ;;  %vm1001_vm9 = vcmp.eq.s32.totalorder %v2433_v9, %v1542_v40 }
 0x2b2   : > { %1881 = vmatprep.subr.bf16.mxu1 %v2185_v4 }
 0x2b5   : > { %1883 = vmatpush3.bf16.msk.msra.mxu1 %vm1882_vm13, %v2186_v10  ;;  %vm1897_vm13 = vmpackc.low %vm1063_vm12, %vm1062_vm11  ;;  %vm1002_vm11 = vcmp.eq.s32.totalorder %v2446_v11, %v1542_v40  ;;  %vm1003_vm12 = vcmp.eq.s32.totalorder %v2449_v12, %v1542_v40 }
 0x2b6   : > { %1884 = vmatprep.subr.bf16.mxu1 %v2185_v4 }
 0x2b9   : > { %1886 = vmatpush3.bf16.msk.msra.mxu1 %vm1885_vm3, %v2186_v10  ;;  %vm1900_vm3 = vmpackc.low %vm1065_vm0, %vm1064_vm15  ;;  %vm1005_vm15 = vcmp.eq.s32.totalorder %v2466_v19, %v1542_v40 }
 0x2ba   : > { %1887 = vmatprep.subr.bf16.mxu1 %v2185_v4 }
 0x2bd   : > { %1889 = vmatpush3.bf16.msk.msra.mxu1 %vm1888_vm4, %v2186_v10  ;;  %vm1903_vm4 = vmpackc.low %vm997_vm2, %vm996_vm1  ;;  %vm1007_vm1 = vcmp.eq.s32.totalorder %v2477_v21, %v1542_v40 }
 0x2be   : > { %v984_v39 = vpop.xlane.xlu1 %983  ;;  %1890 = vmatprep.subr.bf16.mxu1 %v2185_v4 }
 0x2bf   : > { %2048 = vlog2.f32 %v984_v39 }
 0x2c1   : > { %1892 = vmatpush3.bf16.msk.msra.mxu1 %vm1891_vm7, %v2186_v10  ;;  %vm1906_vm7 = vmpackc.low %vm999_vm6, %vm998_vm5  ;;  %vm1009_vm5 = vcmp.eq.s32.totalorder %v2489_v23, %v1542_v40 }
 0x2c2   : > { %1893 = vmatprep.subr.bf16.mxu1 %v2185_v4 }
 0x2c5   : > { %1895 = vmatpush3.bf16.msk.msra.mxu1 %vm1894_vm10, %v2186_v10  ;;  %vm1909_vm10 = vmpackc.low %vm1001_vm9, %vm1000_vm8  ;;  %vm1011_vm8 = vcmp.eq.s32.totalorder %v2501_v25, %v1542_v40 }
 0x2c6   : > { %1896 = vmatprep.subr.bf16.mxu1 %v2185_v4 }
 0x2c9   : > { %v2049_v41 = vpop.eup %2048  ;;  %1898 = vmatpush3.bf16.msk.msra.mxu1 %vm1897_vm13, %v2186_v10  ;;  %vm1004_vm13 = vcmp.eq.s32.totalorder %v2463_v18, %v1542_v40 }
 0x2ca   : > { %v986_v42 = vmul.f32 0.6931472, %v2049_v41  ;;  %1899 = vmatprep.subr.bf16.mxu1 %v2185_v4  ;;  %vm1915_vm0 = vmpackc.low %vm1005_vm15, %vm1004_vm13 }
 0x2cc   : > { %v987_v43 = vsub.f32 %v2513_v28, %v986_v42 }
 0x2cd   : > { %1901 = vmatpush3.bf16.msk.msra.mxu1 %vm1900_vm3, %v2186_v10  ;;  %vm1006_vm3 = vcmp.eq.s32.totalorder %v2474_v20, %v1542_v40 }
 0x2ce   : > { %1540 = vst [vmem:[%s2527_s22 + $0x2] sm:$0x3] %v987_v43  ;;  %1902 = vmatprep.subr.bf16.mxu1 %v2185_v4  ;;  %v1099_v44 = vrot.slane %v987_v43, 1  ;;  %vm1918_vm2 = vmpackc.low %vm1007_vm1, %vm1006_vm3 }
 0x2d0   : > { %1793 = vmatmul.mubr.f32.vlgmr.msra.gmra.mrb[2].mxu1 %v1099_v44 }
 0x2d1   : > { %1904 = vmatpush3.bf16.msk.msra.mxu1 %vm1903_vm4, %v2186_v10  ;;  %1827 = vmatprep.mubr.msk.f32.mxu1 %vm2187_vm14, %v2188_v26  ;;  %vm1912_vm14 = vmpackc.low %vm1003_vm12, %vm1002_vm11  ;;  %vm1008_vm4 = vcmp.eq.s32.totalorder %v2486_v22, %v1542_v40 }
 0x2d2   : > { %1905 = vmatprep.subr.bf16.mxu1 %v2185_v4  ;;  %vm1921_vm6 = vmpackc.low %vm1009_vm5, %vm1008_vm4 }
 0x2d5   : > { %1907 = vmatpush3.bf16.msk.msra.mxu1 %vm1906_vm7, %v2186_v10  ;;  %vm1010_vm7 = vcmp.eq.s32.totalorder %v2498_v24, %v1542_v40 }
 0x2d6   : > { %1908 = vmatprep.subr.bf16.mxu1 %v2185_v4  ;;  %vm1924_vm9 = vmpackc.low %vm1011_vm8, %vm1010_vm7 }
 0x2d9   : > { %1910 = vmatpush3.bf16.msk.msra.mxu1 %vm1909_vm10, %v2186_v10 }
 0x2da   : > { %1911 = vmatprep.subr.bf16.mxu1 %v2185_v4 }
 0x2dd   : > { %1913 = vmatpush3.bf16.msk.msra.mxu1 %vm1912_vm14, %v2186_v10 }
 0x2de   : > { %1914 = vmatprep.subr.bf16.mxu1 %v2185_v4 }
 0x2e1   : > { %1916 = vmatpush3.bf16.msk.msra.mxu1 %vm1915_vm0, %v2186_v10 }
 0x2e2   : > { %1917 = vmatprep.subr.bf16.mxu1 %v2185_v4 }
 0x2e5   : > { %1919 = vmatpush3.bf16.msk.msra.mxu1 %vm1918_vm2, %v2186_v10 }
 0x2e6   : > { %1920 = vmatprep.subr.bf16.mxu1 %v2185_v4 }
 0x2e9   : > { %1922 = vmatpush3.bf16.msk.msra.mxu1 %vm1921_vm6, %v2186_v10 }
 0x2ea   : > { %1923 = vmatprep.subr.bf16.mxu1 %v2185_v4 }
 0x2ed   : > { %1925 = vmatpush3.bf16.msk.msra.mxu1 %vm1924_vm9, %v2186_v10 }
 0x2f0   : > { %1828 = vmatmul.mubr.f32.vlgmr.msra.gmra.mrb[2].mxu1 %v987_v43 }
 0x2f1   : > { %2093 = shalt.err (!%p2090_p4)
}
 0x2f2   : > { %s2094_s12 = scalar_lea.hbm %s2640_s9, 64  ;;  %s2098_s29 = scalar_lea.hbm %s2723_s6, 128 }
 0x2f3   : > { %p2095_p5 = scmp.ne.s32.totalorder %s2640_s9, %s2094_s12  ;;  %p2099_p1 = scmp.lt.u32.totalorder %s2640_s9, %s2723_s6 }
 0x2f4   : > { %p2100_p3 = scmp.lt.u32.totalorder %s2098_s29, %s2094_s12  ;;  %p2102_p11 = scmp.lt.u32.totalorder %s2094_s12, %s2640_s9 }
 0x2f5   : > { %p2096_p7 = pnand %p2095_p5, %p2731_p12 }
 0x2f6   : > { %p2101_p6 = por %p2100_p3, %p2099_p1 }
 0x2f7   : > { %p2097_p9 = pneg %p2096_p7 }
 0x2f8   : > { %p2103_p13 = por %p2102_p11, %p2101_p6 }
 0x2fa   : > { %p2104_p8 = pnand %p2103_p13, %p2097_p9 }
 0x2fc   : > { %2107 = shalt.err (!%p2104_p8)
}
 0x2fd   : > { %s2190_s11 = smov 32   ;;  %s2191_s17 = smov 2   ;;  %vm827_vm10 = vcmask 57344  }
 0x2fe   : > { %1932 = dma.vmem_to_hbm [thread:$0]  (%p2731_p12), %s2634_s23, 64, %s2640_s9, %s1244_s8, %s2190_s11, %s2190_s11, %s2191_s17  }
 0x2ff   : > { %s1420_s18 = sshll.u32 %s2339_s16, 1  ;;  %s1621_s20 = sshll.u32 %s2256_s28, 5 }
 0x300   : > { %s350_s15 = scalar_lea.vmem [#allocation6], %s1420_s18  ;;  %s2673_s19 = scalar_lea.hbm %s2724_s7, %s1621_s20 }
 0x301   : > { %s1278_s12 = sshll.u32 %s350_s15, 4  ;;  %s1249_s23 = scalar_lea.sflag [#allocation7], %s2339_s16  ;;  %s2668_s12 = int_to_ptr.vmem [resolvable:$true] %s1278_s12 }
 0x302   : > { %s2108_s9 = scalar_lea.vmem %s2668_s12, 32  ;;  %s2192_s28 = smov [#allocation6]  }
 0x303   : > { %p2109_p10 = scmp.ne.s32.totalorder %s2668_s12, %s2108_s9  ;;  %s2112_s8 = sshll.u32 %s2192_s28, 4  ;;  %s2113_s8 = int_to_ptr.vmem [resolvable:$false] %s2112_s8 }
 0x304   : > { %s2114_s21 = scalar_lea.vmem %s2113_s8, 64  ;;  %p2115_p4 = scmp.lt.s32.totalorder %s2668_s12, %s2113_s8 }
 0x305   : > { %p2110_p0 = pnand %p2109_p10, %p2731_p12  ;;  %p2116_p5 = scmp.lt.s32.totalorder %s2114_s21, %s2108_s9 }
 0x307   : > { %p2111_p2 = pneg %p2110_p0  ;;  %p2117_p7 = por %p2116_p5, %p2115_p4 }
 0x309   : > { %p2118_p9 = pnand %p2117_p7, %p2111_p2 }
 0x383   : > { %v823_v7 = vpop.f32.mrb[0].mxu1 }
 0x384   : > { %828 = vst.msk [vmem:[%s350_s15] sm:$0x1] %vm827_vm10, %v823_v7  ;;  %v1759_v45 = vpop.f32.mrb[1].mxu1 }
 0x3c3   : > { %v1237_v46 = vpop.f32.mrb[2].mxu1 }
 0x3c4   : > { %1609 = vst.msk [vmem:[%s350_s15 + $0x1] sm:$0x1] %vm827_vm10, %v1237_v46  ;;  %v1829_v47 = vpop.f32.mrb[3].mxu1 }
 0x3c5   : > { %2121 = shalt.err (!%p2118_p9)
}
 0x3c6   : > { %s2122_s11 = scalar_lea.hbm %s2673_s19, 32  ;;  %s2126_s15 = scalar_lea.hbm %s2724_s7, 64 }
 0x3c7   : > { %p2123_p1 = scmp.ne.s32.totalorder %s2673_s19, %s2122_s11  ;;  %p2127_p11 = scmp.lt.u32.totalorder %s2673_s19, %s2724_s7 }
 0x3c8   : > { %p2128_p13 = scmp.lt.u32.totalorder %s2126_s15, %s2122_s11  ;;  %p2130_p10 = scmp.lt.u32.totalorder %s2122_s11, %s2673_s19 }
 0x3c9   : > { %p2124_p3 = pnand %p2123_p1, %p2731_p12 }
 0x3ca   : > { %p2129_p8 = por %p2128_p13, %p2127_p11 }
 0x3cb   : > { %p2125_p6 = pneg %p2124_p3 }
 0x3cc   : > { %p2131_p0 = por %p2130_p10, %p2129_p8 }
 0x3ce   : > { %p2132_p2 = pnand %p2131_p0, %p2125_p6 }
 0x3d0   : > { %2135 = shalt.err (!%p2132_p2)
}
 0x3d1   : > { %s2193_s29 = smov 16   ;;  %s2194_s9 = smov 1  }
 0x3d2   : > { %1933 = dma.vmem_to_hbm [thread:$0]  (%p2731_p12), %s2668_s12, 32, %s2673_s19, %s1249_s23, %s2193_s29, %s2193_s29, %s2194_s9  }
 0x3d3 PF: > { %s1293_s28 = sand.u32 1, %s2166_s24   ;;  %p2732_p4 = scmp.ne.s32.totalorder %s2729_s14, 0 }
 0x3d4   : > { %p2733_p5 = scmp.ge.s32.totalorder %s2178_s27, 2  ;;  %s1294_s8 = scalar_lea.sflag [#allocation4], %s1293_s28 }
 0x3d6   : > { %p1941_p7 = pnand %p2733_p5, %p2732_p4 }
 0x3d8   : > { %2157 = dma.done.wait (!%p1941_p7), %s1294_s8, 64  }
 0x3d9   : > { %2159 = vsyncadd (!%p1941_p7), %s1294_s8, 4294967232  ;;  %s1303_s21 = scalar_lea.sflag [#allocation7], %s1293_s28 }
 0x3da   : > { %2161 = dma.done.wait (!%p1941_p7), %s1303_s21, 32  }
 0x3db   : > { %2163 = vsyncadd (!%p1941_p7), %s1303_s21, 4294967264  ;;  %p24_p12 = scmp.ge.s32.totalorder %s2260_s30, 4   ;;  %s2734_s24 = smov %s2170_s25 }
 0x3dc   : > { %s2735_s25 = smov %s2174_s26  ;;  %s2736_s26 = smov %s2272_s10 }
 0x3dd   : > { %s2737_s27 = smov %s2260_s30  ;;  %26 = sbr.rel (!%p24_p12) target bundleno = 7 (0x7), region = 121 }
 0x3e4   :  { %1308 = vsyncpa [#allocation3], 1 }
 0x3e5   :  { %1310 = vsyncpa [#allocation3 + $0x1], 1 }
 0x3e6   :  { %1311 = vsyncpa [#allocation4], 1 }
 0x3e7   :  { %1313 = vsyncpa [#allocation4 + $0x1], 1 }
 0x3e8   :  { %1314 = vsyncpa [#allocation7], 1 }
 0x3e9   :  { %1316 = vsyncpa [#allocation7 + $0x1], 1 }

</bundles_post_ra>
